<compile_context>
chip_gen: v7x
topology: tpu7x:2x2x1
jax: 0.10.0
libtpu: 0.0.40
codegen_flags: <defaults>
</compile_context>

<pallas_src>
import functools

import jax
import jax.numpy as jnp
from jax import lax
from jax.experimental import pallas as pl
from jax.experimental.pallas import tpu as pltpu


# Safe on v7x (64 MiB physical per TC) with headroom; larger than the default
# scoped limits on v5e (16 MiB) / v6e (32 MiB) so big batch tiles are allowed.
_VMEM_LIMIT_BYTES = 48 * 1024 * 1024


def _attention_kernel(x_ref, w_ref, ctx_ref, aw_ref, *, use_mxu):
    """One batch tile: linear(H->1) -> softmax(seq) -> weighted sum(seq).

    x_ref:   (S, TB, H) VMEM  input block (seq, batch-tile, hidden)
    w_ref:   (H, 1) VMEM (MXU path)  or  (1, H) VMEM (VPU fallback)
    ctx_ref: (TB, H) VMEM  context-vector block (lane-dense: H on lanes)
    aw_ref:  (S, TB, 1) VMEM  attention-weights block
    """
    x = x_ref[...].astype(jnp.float32)          # f32 math (matches torch; v5e-safe)
    S, TB, H = x.shape

    # ---- logits: contract over H (bias dropped: shift-invariant under softmax) ----
    if use_mxu:
        # MXU matvec: (S*TB, H) @ (H, 1).  TB % 8 == 0, so the fold to (S*TB, H)
        # and the split back to (S, TB, 1) are sublane-tile aligned (no relayout).
        x2 = x.reshape(S * TB, H)
        w = w_ref[...].astype(jnp.float32)                     # (H, 1)
        logits = jnp.dot(
            x2, w,
            preferred_element_type=jnp.float32,
            precision=lax.Precision.HIGHEST,
        ).reshape(S, TB, 1)                                     # (S, TB, 1)
    else:
        # Small / odd batch tile: VPU multiply + lane reduce (original style).
        w = w_ref[...].astype(jnp.float32)                      # (1, H)
        logits = jnp.sum(x * w[None, :, :], axis=-1, keepdims=True)  # (S, TB, 1)

    # ---- numerically-stable softmax over the sequence axis (leading axis) ----
    m = jnp.max(logits, axis=0, keepdims=True)                  # (1, TB, 1)
    e = jnp.exp(logits - m)                                     # (S, TB, 1)  (EUP)
    denom = jnp.sum(e, axis=0, keepdims=True)                   # (1, TB, 1)

    # EUP approx reciprocal + one Newton step: full f32 accuracy, no VALU divide.
    inv = pl.reciprocal(denom, approx=True)
    inv = inv * (2.0 - denom * inv)                             # (1, TB, 1)

    # ---- weighted sum over seq; reuse e for both outputs ----
    num = jnp.sum(e * x, axis=0)                                # (TB, H)
    ctx_ref[...] = (num * inv[0]).astype(ctx_ref.dtype)         # (TB, H), lane-dense
    aw_ref[...] = (e * inv).astype(aw_ref.dtype)                # (S, TB, 1)


def _block_footprint_bytes(S, tb, H, itemsize):
    in_blk = S * tb * H * itemsize            # pipelined input block
    work_f32 = 2 * S * tb * H * 4             # f32 copy of x + the e*x product
    out_blk = (tb * H + S * tb) * itemsize    # ctx + aw blocks
    return 2 * (in_blk + out_blk) + work_f32  # x2: double-buffered pipeline


def _pick_batch_tile(S, B, H, itemsize, max_batch_tile=None):
    """Largest multiple-of-8 batch tile dividing B that fits the VMEM budget."""
    cap = B if max_batch_tile is None else max(1, min(B, max_batch_tile))
    if B % 8 != 0:
        return B, False                        # whole batch in one block; VPU path
    budget = (2 * _VMEM_LIMIT_BYTES) // 3
    cands = [t for t in range(8, cap + 1, 8) if B % t == 0] or [8]
    fits = [t for t in cands if _block_footprint_bytes(S, t, H, itemsize) <= budget]
    return (max(fits) if fits else min(cands)), True


def attention_forward(lstm_output, weight, bias=None, *, max_batch_tile=None):
    """Forward pass of the PyTorch `Attention` module.

    lstm_output: (S, B, H);  weight: (1, H) = nn.Linear(H, 1).weight;  bias: (1,)
    Returns (context_vector (B, H), attention_weights (S, B, 1)).

    The Linear bias is the same scalar for every position along the softmax axis,
    so it cancels exactly in the softmax and is intentionally not passed in.
    """
    del bias  # exact no-op under softmax over dim 0
    S, B, H = lstm_output.shape
    tb, use_mxu = _pick_batch_tile(S, B, H, lstm_output.dtype.itemsize, max_batch_tile)
    w_in = weight.reshape(H, 1) if use_mxu else weight.reshape(1, H)

    kernel = functools.partial(_attention_kernel, use_mxu=use_mxu)
    ctx, aw = pl.pallas_call(
        kernel,
        grid=(B // tb,),
        in_specs=[
            pl.BlockSpec((S, tb, H), lambda b: (0, b, 0)),
            pl.BlockSpec(w_in.shape, lambda b: (0, 0)),
        ],
        out_specs=(
            pl.BlockSpec((tb, H), lambda b: (b, 0)),
            pl.BlockSpec((S, tb, 1), lambda b: (0, b, 0)),
        ),
        out_shape=(
            jax.ShapeDtypeStruct((B, H), lstm_output.dtype),
            jax.ShapeDtypeStruct((S, B, 1), lstm_output.dtype),
        ),
        compiler_params=pltpu.CompilerParams(
            dimension_semantics=("parallel",),       # megacore / v7x 2-TC sharding
            vmem_limit_bytes=_VMEM_LIMIT_BYTES,
        ),
    )(lstm_output, w_in)
    return ctx, aw


def attention_reference(lstm_output, weight, bias):
    """Pure-JAX reference matching the PyTorch module (bias included)."""
    logits = jnp.einsum("sbh,oh->sbo", lstm_output, weight,
                        precision=lax.Precision.HIGHEST) + bias
    aw = jax.nn.softmax(logits, axis=0)
    ctx = jnp.sum(aw * lstm_output, axis=0)
    return ctx, aw


if __name__ == "__main__":
    # Small but layout-friendly demo shapes: batch multiple of 8 (sublane axis),
    # hidden multiple of 128 (lane axis).  max_batch_tile=8 -> grid of 2 blocks,
    # exercising the pipelined, multi-step batch grid.
    SEQ, BATCH, HIDDEN = 8, 16, 128

    key = jax.random.PRNGKey(0)
    kx, kw, kb = jax.random.split(key, 3)

    # Same init scheme as nn.Linear: U(-1/sqrt(H), 1/sqrt(H)).
    bound = 1.0 / (HIDDEN ** 0.5)
    weight = jax.random.uniform(kw, (1, HIDDEN), jnp.float32, -bound, bound)
    bias = jax.random.uniform(kb, (1,), jnp.float32, -bound, bound)

    lstm_output = jax.random.normal(kx, (SEQ, BATCH, HIDDEN), jnp.float32)

    ctx, aw = attention_forward(lstm_output, weight, bias, max_batch_tile=8)
    jax.block_until_ready((ctx, aw))

    ctx_ref, aw_ref = attention_reference(lstm_output, weight, bias)
    assert ctx.shape == (BATCH, HIDDEN)
    assert aw.shape == (SEQ, BATCH, 1)
    assert jnp.allclose(ctx, ctx_ref, atol=1e-4, rtol=1e-4)
    assert jnp.allclose(aw, aw_ref, atol=1e-4, rtol=1e-4)

    print("KERNEL_OK")
</pallas_src>

<mosaic_0001>
module attributes {stable_mosaic.version = 11 : i64} {
  func.func @_attention_kernel(%arg0: i32, %arg1: memref<8x8x128xf32, #tpu.memory_space<vmem>>, %arg2: memref<128x1xf32, #tpu.memory_space<vmem>>, %arg3: memref<8x128xf32, #tpu.memory_space<vmem>>, %arg4: memref<8x8x1xf32, #tpu.memory_space<vmem>>) attributes {dimension_semantics = [#tpu.dimension_semantics<parallel>], iteration_bounds = array<i64: 2>, scalar_prefetch = 0 : i64, scratch_operands = 0 : i64, tpu.core_type = #tpu.core_type<tc>, window_params = [{transform_indices = @transform_0, window_bounds = array<i64: 8, 8, 128>}, {pipeline_mode = #tpu.pipeline_mode<synchronous>, transform_indices = @transform_1, window_bounds = array<i64: 128, 1>}, {transform_indices = @transform_2, window_bounds = array<i64: 8, 128>}, {transform_indices = @transform_3, window_bounds = array<i64: 8, 8, 1>}]} {
    %c0 = arith.constant 0 : index
    %c0_0 = arith.constant 0 : index
    %c0_1 = arith.constant 0 : index
    %0 = vector.load %arg1[%c0, %c0_0, %c0_1] : memref<8x8x128xf32, #tpu.memory_space<vmem>>, vector<8x8x128xf32>
    %1 = vector.shape_cast %0 : vector<8x8x128xf32> to vector<64x128xf32>
    %c0_2 = arith.constant 0 : index
    %c0_3 = arith.constant 0 : index
    %2 = vector.load %arg2[%c0_2, %c0_3] : memref<128x1xf32, #tpu.memory_space<vmem>>, vector<128x1xf32>
    %cst = arith.constant dense<0.000000e+00> : vector<64x1xf32>
    %3 = tpu.matmul %1, %2, %cst {dimension_numbers = #tpu.dot_dimension_numbers<[1], [0], [0], [1], [0, 0, 1, 1], [], []>, precision = #tpu.contract_precision<fp32>} : vector<64x128xf32>, vector<128x1xf32>, vector<64x1xf32> -> vector<64x1xf32>
    %4 = vector.shape_cast %3 : vector<64x1xf32> to vector<8x8x1xf32>
    %cst_4 = arith.constant dense<0xFF800000> : vector<8x1xf32>
    %5 = vector.multi_reduction <maximumf>, %4, %cst_4 [0] : vector<8x8x1xf32> to vector<8x1xf32>
    %6 = vector.shape_cast %5 : vector<8x1xf32> to vector<1x8x1xf32>
    %7 = vector.broadcast %6 : vector<1x8x1xf32> to vector<8x8x1xf32>
    %8 = arith.subf %4, %7 : vector<8x8x1xf32>
    %9 = math.exp %8 : vector<8x8x1xf32>
    %cst_5 = arith.constant dense<0.000000e+00> : vector<8x1xf32>
    %10 = vector.multi_reduction <add>, %9, %cst_5 [0] : vector<8x8x1xf32> to vector<8x1xf32>
    %11 = vector.shape_cast %10 : vector<8x1xf32> to vector<1x8x1xf32>
    %12 = tpu.reciprocal %11 {approx = true} : vector<1x8x1xf32> -> vector<1x8x1xf32>
    %13 = arith.mulf %11, %12 : vector<1x8x1xf32>
    %cst_6 = arith.constant 2.000000e+00 : f32
    %14 = vector.broadcast %cst_6 : f32 to vector<1x8x1xf32>
    %15 = arith.subf %14, %13 : vector<1x8x1xf32>
    %16 = arith.mulf %12, %15 : vector<1x8x1xf32>
    %17 = vector.broadcast %9 : vector<8x8x1xf32> to vector<8x8x128xf32>
    %18 = arith.mulf %17, %0 : vector<8x8x128xf32>
    %cst_7 = arith.constant dense<0.000000e+00> : vector<8x128xf32>
    %19 = vector.multi_reduction <add>, %18, %cst_7 [0] : vector<8x8x128xf32> to vector<8x128xf32>
    %20 = vector.shape_cast %16 : vector<1x8x1xf32> to vector<8x1xf32>
    %21 = vector.broadcast %20 : vector<8x1xf32> to vector<8x128xf32>
    %22 = arith.mulf %19, %21 : vector<8x128xf32>
    %c0_8 = arith.constant 0 : index
    %c0_9 = arith.constant 0 : index
    %23 = vector.load %arg3[%c0_8, %c0_9] : memref<8x128xf32, #tpu.memory_space<vmem>>, vector<8x128xf32>
    tpu.vector_store %arg3[%c0_8, %c0_9], %22 {strides = array<i32>} : memref<8x128xf32, #tpu.memory_space<vmem>>, vector<8x128xf32>,
    %24 = vector.broadcast %16 : vector<1x8x1xf32> to vector<8x8x1xf32>
    %25 = arith.mulf %9, %24 : vector<8x8x1xf32>
    %c0_10 = arith.constant 0 : index
    %c0_11 = arith.constant 0 : index
    %c0_12 = arith.constant 0 : index
    %26 = vector.load %arg4[%c0_10, %c0_11, %c0_12] : memref<8x8x1xf32, #tpu.memory_space<vmem>>, vector<8x8x1xf32>
    tpu.vector_store %arg4[%c0_10, %c0_11, %c0_12], %25 {strides = array<i32>} : memref<8x8x1xf32, #tpu.memory_space<vmem>>, vector<8x8x1xf32>,
    return
  }
  func.func @transform_0(%arg0: i32) -> (i32, i32, i32) {
    %c0_i32 = arith.constant 0 : i32
    %c0_i32_0 = arith.constant 0 : i32
    %c0_i32_1 = arith.constant 0 : i32
    return %c0_i32, %arg0, %c0_i32_0 : i32, i32, i32
  }
  func.func @transform_1(%arg0: i32) -> (i32, i32) {
    %c0_i32 = arith.constant 0 : i32
    %c0_i32_0 = arith.constant 0 : i32
    %c0_i32_1 = arith.constant 0 : i32
    return %c0_i32, %c0_i32_0 : i32, i32
  }
  func.func @transform_2(%arg0: i32) -> (i32, i32) {
    %c0_i32 = arith.constant 0 : i32
    %c0_i32_0 = arith.constant 0 : i32
    return %arg0, %c0_i32 : i32, i32
  }
  func.func @transform_3(%arg0: i32) -> (i32, i32, i32) {
    %c0_i32 = arith.constant 0 : i32
    %c0_i32_0 = arith.constant 0 : i32
    %c0_i32_1 = arith.constant 0 : i32
    return %c0_i32, %arg0, %c0_i32_0 : i32, i32, i32
  }
}

</mosaic_0001>

<bundles_post_ra>
// kernel: tpu_custom_call.1
= control target key start
LH: loop header
LB: loop body
LE: loop exit
PB: predicated region body
PF: predicated region fallthrough
CT: control target
= control target key end

     0   :  { %9 = vsyncpa [#allocation4], 0  ;;  %s2933_s0 = inlined_call_operand.vmem [shape: f32[8,16,128], index: 0, kind: input, shape index: {}]   ;;  %s2934_s1 = inlined_call_operand.vmem [shape: f32[128,1], index: 1, kind: input, shape index: {}]   ;;  %s2935_s2 = inlined_call_operand.hbm [shape: f32[16,128], index: 2, kind: output, shape index: {0}]   ;;  %s2936_s3 = inlined_call_operand.vmem [shape: f32[8,16,1], index: 3, kind: output, shape index: {1}]  }
   0x1   :  { %11 = vsyncpa [#allocation4 + $0x1], 0  ;;  %s2318_s12 = smov 0   ;;  %s2320_s13 = smov 0  }
   0x2   :  { %s2322_s14 = smov 0   ;;  %s2324_s15 = smov 0  }
   0x3 LB: > { %s2339_s16 = sadd.s32 4294967295, %s2294_s15   ;;  %s1517_s17 = sadd.s32 4294967294, %s2294_s15   ;;  %s2294_s15 = sphi %s2324_s15, %s3015_s15   ;;  %s2290_s14 = sphi %s2322_s14, %s3014_s14   ;;  %s2286_s13 = sphi %s2320_s13, %s3013_s13   ;;  %s2282_s12 = sphi %s2318_s12, %s3012_s12  }
   0x4   : > { %s2343_s18 = sadd.s32 1, %s2294_s15   ;;  %s24_s19 = sadd.s32 1, %s2290_s14 }
   0x5   : > { %s21_s20 = ssub.s32 %s2294_s15, %s2343_s18  ;;  %p31_p0 = scmp.ne.s32.totalorder %s2290_s14, %s2286_s13 }
   0x6   : > { %p22_p1 = scmp.eq.s32.totalorder %s21_s20, 0  ;;  %p32_p2 = scmp.eq.s32.totalorder %s2294_s15, 0 }
   0x7   : > { %p82_p3 = scmp.eq.s32.totalorder %s2339_s16, 1  ;;  %p87_p4 = scmp.ne.s32.totalorder %s2286_s13, %s2282_s12 }
   0x8   : > { %s2355_s21 = scalar_select %p22_p1, %s2290_s14, %s24_s19  }
   0x9   : > { %p33_p5 = por %p32_p2, %p31_p0  ;;  %p2357_p6 = por %p82_p3, %p31_p0 }
   0xa   : > { %p88_p7 = scmp.eq.s32.totalorder %s1517_s17, 1  ;;  %p1519_p9 = scmp.ge.s32.totalorder %s2294_s15, 2 }
   0xc   : > { %p2361_p8 = por %p88_p7, %p87_p4  ;;  %133 = sbr.rel (%p1519_p9) target bundleno = 27 (0x1b), region = 20 }
  0x13   : > { %136 = sbr.rel (!%p33_p5) target bundleno = 27 (0x1b), region = 24  ;;  %s138_s24 = sand.u32 (%p33_p5), 1, %s2290_s14  }
  0x14   : > { %s1521_s25 = sshll.u32 (%p33_p5), %s2294_s15, 3  ;;  %s1520_s26 = sshll.u32 (%p33_p5), %s138_s24, 6 }
  0x15   : > { %s142_s29 = scalar_lea.vmem (%p33_p5), %s2933_s0, %s1521_s25  ;;  %s140_s30 = scalar_lea.vmem (%p33_p5), [#allocation2], %s1520_s26 }
  0x16   : > { %v184_v0 = vld [vmem:[%s142_s29] sm:$0xff] (%p33_p5)  ;;  %v186_v1 = vld [vmem:[%s142_s29 + $0x10] sm:$0xff] (%p33_p5) }
  0x17   : > { %v188_v2 = vld [vmem:[%s142_s29 + $0x20] sm:$0xff] (%p33_p5)  ;;  %185 = vst [vmem:[%s140_s30] sm:$0xff] (%p33_p5), %v184_v0  ;;  %187 = vst [vmem:[%s140_s30 + $0x8] sm:$0xff] (%p33_p5), %v186_v1  ;;  %v190_v3 = vld [vmem:[%s142_s29 + $0x30] sm:$0xff] (%p33_p5) }
  0x18   : > { %189 = vst [vmem:[%s140_s30 + $0x10] sm:$0xff] (%p33_p5), %v188_v2  ;;  %v192_v4 = vld [vmem:[%s142_s29 + $0x40] sm:$0xff] (%p33_p5)  ;;  %v194_v5 = vld [vmem:[%s142_s29 + $0x50] sm:$0xff] (%p33_p5)  ;;  %191 = vst [vmem:[%s140_s30 + $0x18] sm:$0xff] (%p33_p5), %v190_v3 }
  0x19   : > { %193 = vst [vmem:[%s140_s30 + $0x20] sm:$0xff] (%p33_p5), %v192_v4  ;;  %195 = vst [vmem:[%s140_s30 + $0x28] sm:$0xff] (%p33_p5), %v194_v5  ;;  %v196_v6 = vld [vmem:[%s142_s29 + $0x60] sm:$0xff] (%p33_p5)  ;;  %v198_v7 = vld [vmem:[%s142_s29 + $0x70] sm:$0xff] (%p33_p5) }
  0x1a   : > { %197 = vst [vmem:[%s140_s30 + $0x30] sm:$0xff] %v196_v6  ;;  %199 = vst [vmem:[%s140_s30 + $0x38] sm:$0xff] %v198_v7 }
  0x1b PF: > { %p1522_p10 = scmp.ge.s32.totalorder %s2294_s15, 1  ;;  %p204_p11 = scmp.lt.s32.totalorder %s2294_s15, 3 }
  0x1d   : > { %p205_p12 = pnand %p1522_p10, %p204_p11 }
  0x1f   : > { %208 = sbr.rel (%p205_p12) target bundleno = 573 (0x23d), region = 62 }
  0x26   : > { %v246_v8 = vld [vmem:[%s2934_s1] sm:$0xff]  ;;  %v247_v9 = vld [vmem:[%s2934_s1 + $0x8] sm:$0xff]  ;;  %v248_v10 = vld [vmem:[%s2934_s1 + $0x10] sm:$0xff]  ;;  %s2385_s10 = sand.u32 1, %s2286_s13   ;;  %vm1204_vm0 = vcmask 7168   ;;  %s1528_s6 = sshll.u32 %s2339_s16, 7 }
  0x27   : > { %v263_v11 = vand.u32 4294901760, %v246_v8  ;;  %v266_v12 = vand.u32 4294901760, %v247_v9  ;;  %v2390_v13 = vld [vmem:[%s2934_s1 + $0x18] sm:$0xff]  ;;  %v269_v14 = vand.u32 4294901760, %v248_v10  ;;  %v2395_v15 = vld [vmem:[%s2934_s1 + $0x20] sm:$0xff]  ;;  %v2400_v16 = vld [vmem:[%s2934_s1 + $0x28] sm:$0xff]  ;;  %s2875_s17 = scalar_lea.hbm %s2935_s2, %s1528_s6 }
  0x28   : > { %v272_v17 = vand.u32 4294901760, %v2390_v13  ;;  %v275_v19 = vand.u32 4294901760, %v2395_v15  ;;  %v278_v20 = vand.u32 4294901760, %v2400_v16  ;;  %v2412_v22 = vld [vmem:[%s2934_s1 + $0x30] sm:$0xff]  ;;  %v2417_v23 = vld [vmem:[%s2934_s1 + $0x38] sm:$0xff]  ;;  %s1523_s30 = sshll.u32 %s2385_s10, 6 }
  0x29   : > { %v2403_v18 = vpack.c.bf16 %v266_v12, %v263_v11  ;;  %s2426_s4 = scalar_lea.vmem [#allocation2], %s1523_s30  ;;  %v281_v26 = vand.u32 4294901760, %v2412_v22  ;;  %v284_v27 = vand.u32 4294901760, %v2417_v23  ;;  %v2447_v29 = vld [vmem:[%s2934_s1 + $0x40] sm:$0xff]  ;;  %v2452_v30 = vld [vmem:[%s2934_s1 + $0x48] sm:$0xff]  ;;  %v2473_v35 = vld [vmem:[%s2934_s1 + $0x50] sm:$0xff]  ;;  %v2493_v42 = vsub.f32 %v246_v8, %v263_v11 }
  0x2a   : > { %v2407_v21 = vpack.c.bf16 %v272_v17, %v269_v14  ;;  %v2429_v24 = vld [vmem:[%s2426_s4] sm:$0xff]  ;;  %v2437_v25 = vpack.c.bf16 %v278_v20, %v275_v19  ;;  %v287_v33 = vand.u32 4294901760, %v2447_v29  ;;  %v290_v34 = vand.u32 4294901760, %v2452_v30  ;;  %v2479_v37 = vld [vmem:[%s2934_s1 + $0x58] sm:$0xff]  ;;  %v2482_v38 = vld [vmem:[%s2426_s4 + $0x8] sm:$0xff]  ;;  %s1342_s19 = scalar_lea.sflag [#allocation4], %s2385_s10 }
  0x2b   : > { %1941 = vmatprep.subr.bf16.mxu1 %v2403_v18  ;;  %2037 = vmatprep.subr.bf16.mxu0 %v2403_v18  ;;  %2968 = vst [vmem:[#allocation7_spill] sm:$0xff] %v2429_v24  ;;  %v2442_v28 = vand.u32 4294901760, %v2429_v24  ;;  %v2466_v32 = vpack.c.bf16 %v284_v27, %v281_v26  ;;  %2970 = vst [vmem:[#allocation9_spill] sm:$0xff] %v2482_v38  ;;  %v2944_v40 = vand.u32 4294901760, %v2473_v35  ;;  %v2491_v41 = vld [vmem:[%s2934_s1 + $0x60] sm:$0xff]  ;;  %v2943_v45 = vand.u32 4294901760, %v2479_v37 }
  0x2c   : > { %1943 = vmatpush3.bf16.msra.mxu1 %v2403_v18  ;;  %2039 = vmatpush3.bf16.msra.mxu0 %v2403_v18  ;;  %v2495_v43 = vsub.f32 %v247_v9, %v266_v12  ;;  %v2503_v44 = vpack.c.bf16 %v290_v34, %v287_v33  ;;  %v2509_v46 = vld [vmem:[%s2934_s1 + $0x68] sm:$0xff]  ;;  %v2512_v48 = vand.u32 4294901760, %v2482_v38  ;;  %v2940_v49 = vand.u32 4294901760, %v2491_v41  ;;  %v2518_v50 = vld [vmem:[%s2934_s1 + $0x70] sm:$0xff]  ;;  %v2523_v51 = vld [vmem:[%s2934_s1 + $0x78] sm:$0xff]  ;;  %s2297_s24 = smov [#allocation3]  }
  0x2d   : > { %1945 = vmatprep.subr.bf16.mxu1 %v2407_v21  ;;  %2041 = vmatprep.subr.bf16.mxu0 %v2407_v21  ;;  %v2456_v31 = vsub.f32 %v2429_v24, %v2442_v28  ;;  %v2525_v52 = vsub.f32 %v248_v10, %v269_v14  ;;  %v2528_v53 = vld [vmem:[%s2426_s4 + $0x10] sm:$0xff]  ;;  %v2939_v54 = vand.u32 4294901760, %v2509_v46  ;;  %v426_v55 = vand.u32 4294901760, %v2493_v42  ;;  %v2561_v0 = vld [vmem:[%s2426_s4 + $0x18] sm:$0xff]  ;;  %v2565_v2 = vld [vmem:[%s2426_s4 + $0x20] sm:$0xff]  ;;  %s2236_s25 = sshll.u32 %s2297_s24, 4  ;;  %s2237_s25 = int_to_ptr.vmem [resolvable:$false] %s2236_s25 }
  0x2e   : > { %2971 = vst [vmem:[#allocation10_spill] sm:$0xff] %v2503_v44  ;;  %2972 = vst [vmem:[#allocation11_spill] sm:$0xff] %v2528_v53  ;;  %v433_v56 = vand.u32 4294901760, %v2495_v43  ;;  %v2536_v57 = vsub.f32 %v2390_v13, %v272_v17  ;;  %v2544_v58 = vpack.c.bf16 %v2943_v45, %v2944_v40  ;;  %v2548_v59 = vsub.f32 %v2482_v38, %v2512_v48  ;;  %v2604_v14 = vld [vmem:[%s2426_s4 + $0x28] sm:$0xff]  ;;  %v2673_v45 = vld [vmem:[%s2426_s4 + $0x38] sm:$0xff]  ;;  %s2238_s26 = scalar_lea.vmem %s2237_s25, 256 }
  0x2f   : > { %2969 = vst [vmem:[#allocation8_spill] sm:$0xff] %v2456_v31  ;;  %v345_v36 = vand.u32 4294901760, %v2456_v31  ;;  %v2553_v60 = vsub.f32 %v2395_v15, %v275_v19  ;;  %v2938_v61 = vand.u32 4294901760, %v2518_v50  ;;  %v2937_v62 = vand.u32 4294901760, %v2523_v51  ;;  %2974 = vst [vmem:[#allocation13_spill] sm:$0xff] %v2561_v0 }
  0x30   : > { %1947 = vmatpush3.bf16.msra.mxu1 %v2407_v21  ;;  %2043 = vmatpush3.bf16.msra.mxu0 %v2407_v21  ;;  %2973 = vst [vmem:[#allocation12_spill] sm:$0xff] %v2544_v58  ;;  %v2558_v63 = vand.u32 4294901760, %v2528_v53  ;;  %v440_v1 = vand.u32 4294901760, %v2525_v52  ;;  %2975 = vst [vmem:[#allocation14_spill] sm:$0xff] %v2565_v2  ;;  %v2573_v3 = vpack.c.bf16 %v2939_v54, %v2940_v49  ;;  %v447_v6 = vand.u32 4294901760, %v2536_v57 }
  0x31   : > { %1949 = vmatprep.subr.bf16.mxu1 %v2437_v25  ;;  %2045 = vmatprep.subr.bf16.mxu0 %v2437_v25  ;;  %v346_v39 = vsub.f32 %v2456_v31, %v345_v36  ;;  %v427_v4 = vsub.f32 %v2493_v42, %v426_v55  ;;  %v434_v5 = vsub.f32 %v2495_v43, %v433_v56  ;;  %v2941_v7 = vand.u32 4294901760, %v2548_v59 }
  0x32   : > { %1840 = vmatprep.mubr.f32.mxu0 %v345_v36  ;;  %2976 = vst [vmem:[#allocation15_spill] sm:$0xff] %v2573_v3  ;;  %v2942_v8 = vand.u32 4294901760, %v2553_v60  ;;  %v2585_v9 = vsub.f32 %v2400_v16, %v278_v20  ;;  %v2588_v10 = vand.u32 4294901760, %v2561_v0  ;;  %v2594_v11 = vpack.c.bf16 %v2937_v62, %v2938_v61  ;;  %2979 = vst [vmem:[#allocation18_spill] sm:$0xff] %v2604_v14  ;;  %v2619_v20 = vld [vmem:[%s2426_s4 + $0x30] sm:$0xff]  ;;  %s2844_s4 = scalar_lea.vmem [#allocation5], %s1523_s30 }
  0x33   : > { %v347_v47 = vand.u32 4294901760, %v346_v39  ;;  %v2598_v12 = vsub.f32 %v2528_v53, %v2558_v63  ;;  %v2601_v13 = vand.u32 4294901760, %v2565_v2  ;;  %v2606_v15 = vpack.c.bf16 %v433_v56, %v426_v55  ;;  %2981 = vst [vmem:[#allocation20_spill] sm:$0xff] %v2619_v20  ;;  %2984 = vst [vmem:[#allocation23_spill] sm:$0xff] %v2673_v45  ;;  %s1524_s30 = sshll.u32 %s2385_s10, 3 }
  0x34   : > { %1951 = vmatpush3.bf16.msra.mxu1 %v2437_v25  ;;  %2047 = vmatpush3.bf16.msra.mxu0 %v2437_v25  ;;  %2977 = vst [vmem:[#allocation16_spill] sm:$0xff] %v2594_v11  ;;  %v441_v16 = vsub.f32 %v2525_v52, %v440_v1  ;;  %v2612_v17 = vsub.f32 %v2412_v22, %v281_v26  ;;  %v428_v36 = vand.u32 4294901760, %v427_v4  ;;  %v435_v39 = vand.u32 4294901760, %v434_v5  ;;  %s231_s7 = scalar_lea.vmem [#allocation3], %s1524_s30 }
  0x35   : > { %1953 = vmatprep.subr.bf16.mxu1 %v2466_v32  ;;  %2049 = vmatprep.subr.bf16.mxu0 %v2466_v32  ;;  %2978 = vst [vmem:[#allocation17_spill] sm:$0xff] %v2598_v12  ;;  %v2616_v19 = vsub.f32 %v2561_v0, %v2588_v10  ;;  %v2627_v55 = vsub.f32 %v2417_v23, %v284_v27  ;;  %v461_v56 = vand.u32 4294901760, %v2585_v9  ;;  %v2641_v4 = vand.u32 4294901760, %v2604_v14  ;;  %s1359_s8 = sshll.u32 %s231_s7, 4  ;;  %s2877_s8 = int_to_ptr.vmem [resolvable:$true] %s1359_s8 }
  0x36   : > { %1708 = vmatprep.mubr.f32.mxu1 %v347_v47  ;;  %v448_v47 = vsub.f32 %v2536_v57, %v447_v6  ;;  %v356_v22 = vsub.f32 %v2548_v59, %v2941_v7  ;;  %v2637_v26 = vsub.f32 %v2553_v60, %v2942_v8  ;;  %v2643_v23 = vpack.c.bf16 %v447_v6, %v440_v1  ;;  %s2232_s20 = scalar_lea.vmem %s2877_s8, 128  ;;  %p2239_p2 = scmp.lt.s32.totalorder %s2877_s8, %s2237_s25 }
  0x37   : > { %2980 = vst [vmem:[#allocation19_spill] sm:$0xff] %v2616_v19  ;;  %v365_v27 = vand.u32 4294901760, %v2598_v12  ;;  %v2648_v5 = vsub.f32 %v2565_v2, %v2601_v13  ;;  %v2651_v62 = vand.u32 4294901760, %v2619_v20  ;;  %v442_v61 = vand.u32 4294901760, %v441_v16  ;;  %p2233_p13 = scmp.ne.s32.totalorder %s2877_s8, %s2232_s20  ;;  %p2240_p3 = scmp.lt.s32.totalorder %s2238_s26, %s2232_s20 }
  0x38   : > { %1955 = vmatpush3.bf16.msra.mxu1 %v2466_v32  ;;  %2051 = vmatpush3.bf16.msra.mxu0 %v2466_v32  ;;  %v468_v54 = vand.u32 4294901760, %v2612_v17  ;;  %v375_v49 = vand.u32 4294901760, %v2616_v19  ;;  %v2657_v7 = vsub.f32 %v2604_v14, %v2641_v4  ;;  %v1972_v1 = vpack.c.bf16 %v435_v39, %v428_v36 }
  0x39   : > { %1957 = vmatprep.subr.bf16.mxu1 %v2503_v44  ;;  %2053 = vmatprep.subr.bf16.mxu0 %v2503_v44  ;;  %2982 = vst [vmem:[#allocation21_spill] sm:$0xff] %v2648_v5  ;;  %v475_v6 = vand.u32 4294901760, %v2627_v55  ;;  %v2665_v8 = vsub.f32 %v2447_v29, %v287_v33  ;;  %v2670_v16 = vsub.f32 %v2452_v30, %v290_v34  ;;  %v357_v40 = vand.u32 4294901760, %v356_v22  ;;  %p2234_p0 = pnand %p2233_p13, %p2357_p6  ;;  %p2241_p4 = por %p2240_p3, %p2239_p2 }
  0x3a   : > { %2983 = vst [vmem:[#allocation22_spill] sm:$0xff] %v2657_v7  ;;  %v449_v36 = vand.u32 4294901760, %v448_v47  ;;  %v456_v39 = vand.u32 4294901760, %v2637_v26  ;;  %v462_v14 = vsub.f32 %v2585_v9, %v461_v56  ;;  %v366_v29 = vsub.f32 %v2598_v12, %v365_v27 }
  0x3b   : > { %v2985_v33 = vand.u32 4294901760, %v2473_v35  ;;  %v385_v30 = vand.u32 4294901760, %v2648_v5  ;;  %v2688_v34 = vsub.f32 %v2619_v20, %v2651_v62  ;;  %v469_v22 = vsub.f32 %v2612_v17, %v468_v54  ;;  %p2235_p1 = pneg %p2234_p0 }
  0x3c   : > { %1959 = vmatpush3.bf16.msra.mxu1 %v2503_v44  ;;  %2055 = vmatpush3.bf16.msra.mxu0 %v2503_v44  ;;  %v376_v47 = vsub.f32 %v2616_v19, %v375_v49  ;;  %v395_v26 = vand.u32 4294901760, %v2657_v7  ;;  %v2694_v0 = vand.u32 4294901760, %v2673_v45  ;;  %v489_v20 = vand.u32 4294901760, %v2670_v16 }
  0x3d   : > { %1961 = vmatprep.subr.bf16.mxu1 %v2544_v58  ;;  %2057 = vmatprep.subr.bf16.mxu0 %v2544_v58  ;;  %v2683_v2 = vsub.f32 %v2473_v35, %v2985_v33  ;;  %v476_v35 = vsub.f32 %v2627_v55, %v475_v6  ;;  %v482_v33 = vand.u32 4294901760, %v2665_v8  ;;  %v2986_v53 = vand.u32 4294901760, %v2479_v37  ;;  %p2242_p5 = pnand %p2241_p4, %p2235_p1 }
  0x3e   : > { %v1976_v38 = vpack.c.bf16 %v449_v36, %v442_v61  ;;  %v463_v19 = vand.u32 4294901760, %v462_v14  ;;  %v2987_v12 = vand.u32 4294901760, %v2553_v60  ;;  %v386_v44 = vsub.f32 %v2648_v5, %v385_v30 }
  0x3f   : > { %v2704_v24 = vsub.f32 %v2479_v37, %v2986_v53  ;;  %v405_v37 = vand.u32 4294901760, %v2688_v34  ;;  %v2988_v53 = vand.u32 4294901760, %v2548_v59  ;;  %v470_v61 = vand.u32 4294901760, %v469_v22 }
  0x40   : > { %1963 = vmatpush3.bf16.msra.mxu1 %v2544_v58  ;;  %2059 = vmatpush3.bf16.msra.mxu0 %v2544_v58  ;;  %v367_v58 = vand.u32 4294901760, %v366_v29  ;;  %v377_v14 = vand.u32 4294901760, %v376_v47  ;;  %v396_v36 = vsub.f32 %v2657_v7, %v395_v26  ;;  %v483_v29 = vsub.f32 %v2665_v8, %v482_v33 }
  0x41   : > { %1965 = vmatprep.subr.bf16.mxu1 %v2573_v3  ;;  %2061 = vmatprep.subr.bf16.mxu0 %v2573_v3  ;;  %v490_v31 = vsub.f32 %v2670_v16, %v489_v20  ;;  %v2989_v22 = vand.u32 4294901760, %v2491_v41  ;;  %v2080_v7 = vpack.c.bf16 %v475_v6, %v468_v54  ;;  %v2991_v5 = vand.u32 4294901760, %v2683_v2 }
  0x43   : > { %v2728_v47 = vsub.f32 %v2491_v41, %v2989_v22  ;;  %v484_v22 = vand.u32 4294901760, %v483_v29 }
  0x44   : > { %1967 = vmatpush3.bf16.msra.mxu1 %v2573_v3  ;;  %2063 = vmatpush3.bf16.msra.mxu0 %v2573_v3  ;;  %v2076_v3 = vpack.c.bf16 %v461_v56, %v2987_v12  ;;  %v477_v56 = vand.u32 4294901760, %v476_v35  ;;  %v387_v35 = vand.u32 4294901760, %v386_v44 }
  0x45   : > { %1969 = vmatprep.subr.bf16.mxu1 %v2594_v11  ;;  %2065 = vmatprep.subr.bf16.mxu0 %v2594_v11  ;;  %v510_v54 = vand.u32 4294901760, %v2728_v47 }
  0x48   : > { %1971 = vmatpush3.bf16.msra.mxu1 %v2594_v11  ;;  %2067 = vmatpush3.bf16.msra.mxu0 %v2594_v11  ;;  %v2711_v11 = vsub.f32 %v2673_v45, %v2694_v0  ;;  %v503_v45 = vand.u32 4294901760, %v2704_v24 }
  0x49   : > { %1973 = vmatprep.subr.bf16.mxu1 %v1972_v1  ;;  %2069 = vmatprep.subr.bf16.mxu0 %v2606_v15 }
  0x4a   : > { %v415_v12 = vand.u32 4294901760, %v2711_v11  ;;  %v504_v44 = vsub.f32 %v2704_v24, %v503_v45 }
  0x4b   : > { %1709 = vmatmul.mubr.f32.vlgmr.msra.gmra.mrb[0].mxu1 %v357_v40  ;;  %1841 = vmatmul.mubr.f32.vlgmr.msra.gmra.mrb[0].mxu0 %v2988_v53  ;;  %v1980_v40 = vpack.c.bf16 %v463_v19, %v456_v39  ;;  %v406_v53 = vsub.f32 %v2688_v34, %v405_v37  ;;  %v497_v19 = vsub.f32 %v2683_v2, %v2991_v5  ;;  %v397_v39 = vand.u32 4294901760, %v396_v36 }
  0x4c   : > { %1975 = vmatpush3.bf16.msra.mxu1 %v1972_v1  ;;  %2071 = vmatpush3.bf16.msra.mxu0 %v2606_v15  ;;  %v2990_v1 = vand.u32 4294901760, %v2509_v46  ;;  %v416_v41 = vsub.f32 %v2711_v11, %v415_v12  ;;  %v2992_v5 = vand.u32 4294901760, %v2518_v50 }
  0x4d   : > { %1977 = vmatprep.subr.bf16.mxu1 %v1976_v38  ;;  %2073 = vmatprep.subr.bf16.mxu0 %v2643_v23  ;;  %v498_v36 = vand.u32 4294901760, %v497_v19 }
  0x4e   : > { %v2733_v15 = vsub.f32 %v2509_v46, %v2990_v1  ;;  %1711 = vmatprep.mubr.f32.mxu1 %v367_v58  ;;  %1843 = vmatprep.mubr.f32.mxu0 %v365_v27  ;;  %v1984_v46 = vpack.c.bf16 %v477_v56, %v470_v61  ;;  %v491_v58 = vand.u32 4294901760, %v490_v31  ;;  %v407_v31 = vand.u32 4294901760, %v406_v53 }
  0x4f   : > { %1712 = vmatmul.mubr.f32.gmra.mrb[2].mxu1 %v377_v14  ;;  %1844 = vmatmul.mubr.f32.gmra.mrb[2].mxu0 %v375_v49  ;;  %v2747_v49 = vsub.f32 %v2518_v50, %v2992_v5  ;;  %v417_v6 = vand.u32 4294901760, %v416_v41  ;;  %v2084_v14 = vpack.c.bf16 %v489_v20, %v482_v33  ;;  %v505_v56 = vand.u32 4294901760, %v504_v44 }
  0x50   : > { %1979 = vmatpush3.bf16.msra.mxu1 %v1976_v38  ;;  %2075 = vmatpush3.bf16.msra.mxu0 %v2643_v23  ;;  %v517_v27 = vand.u32 4294901760, %v2733_v15  ;;  %v2993_v38 = vand.u32 4294901760, %v2523_v51  ;;  %v1988_v61 = vpack.c.bf16 %v491_v58, %v484_v22  ;;  %v511_v50 = vsub.f32 %v2728_v47, %v510_v54 }
  0x51   : > { %1981 = vmatprep.subr.bf16.mxu1 %v1980_v40  ;;  %2077 = vmatprep.subr.bf16.mxu0 %v2076_v3  ;;  %v2994_v20 = vand.u32 4294901760, %v2683_v2  ;;  %v2008_v41 = vpack.c.bf16 %v2536_v57, %v2525_v52  ;;  %v2996_v52 = vld [vmem:[#allocation8_spill] sm:$0xff] }
  0x52   : > { %v2752_v23 = vsub.f32 %v2523_v51, %v2993_v38  ;;  %1714 = vmatprep.mubr.f32.mxu1 %v387_v35  ;;  %1846 = vmatprep.mubr.f32.mxu0 %v385_v30  ;;  %v518_v29 = vsub.f32 %v2733_v15, %v517_v27  ;;  %v524_v51 = vand.u32 4294901760, %v2747_v49  ;;  %v512_v33 = vand.u32 4294901760, %v511_v50  ;;  %v2997_v57 = vld [vmem:[#allocation12_spill] sm:$0xff] }
  0x53   : > { %1715 = vmatmul.mubr.f32.gmra.mrb[4].mxu1 %v397_v39  ;;  %1847 = vmatmul.mubr.f32.gmra.mrb[4].mxu0 %v395_v26  ;;  %v2088_v26 = vpack.c.bf16 %v503_v45, %v2994_v20  ;;  %v2004_v39 = vpack.c.bf16 %v2495_v43, %v2493_v42  ;;  %v2012_v42 = vpack.c.bf16 %v2585_v9, %v2553_v60  ;;  %v2995_v43 = vld [vmem:[#allocation10_spill] sm:$0xff]  ;;  %v3002_v9 = vld [vmem:[#allocation21_spill] sm:$0xff] }
  0x54   : > { %1983 = vmatpush3.bf16.msra.mxu1 %v1980_v40  ;;  %2079 = vmatpush3.bf16.msra.mxu0 %v2076_v3  ;;  %v531_v30 = vand.u32 4294901760, %v2752_v23  ;;  %v1992_v3 = vpack.c.bf16 %v505_v56, %v498_v36  ;;  %v519_v40 = vand.u32 4294901760, %v518_v29  ;;  %v525_v1 = vsub.f32 %v2747_v49, %v524_v51 }
  0x55   : > { %1985 = vmatprep.subr.bf16.mxu1 %v1984_v46  ;;  %2081 = vmatprep.subr.bf16.mxu0 %v2080_v7  ;;  %v2028_v60 = vpack.c.bf16 %v2733_v15, %v2728_v47 }
  0x56   : > { %1717 = vmatprep.mubr.f32.mxu1 %v407_v31  ;;  %1849 = vmatprep.mubr.f32.mxu0 %v405_v37  ;;  %v532_v35 = vsub.f32 %v2752_v23, %v531_v30  ;;  %v2092_v37 = vpack.c.bf16 %v517_v27, %v510_v54  ;;  %v2096_v19 = vpack.c.bf16 %v531_v30, %v524_v51 }
  0x57   : > { %1718 = vmatmul.mubr.f32.gmra.mrb[6].mxu1 %v417_v6  ;;  %1850 = vmatmul.mubr.f32.gmra.mrb[6].mxu0 %v415_v12  ;;  %v526_v12 = vand.u32 4294901760, %v525_v1 }
  0x58   : > { %1987 = vmatpush3.bf16.msra.mxu1 %v1984_v46  ;;  %2083 = vmatpush3.bf16.msra.mxu0 %v2080_v7  ;;  %v1996_v7 = vpack.c.bf16 %v519_v40, %v512_v33  ;;  %v533_v45 = vand.u32 4294901760, %v532_v35 }
  0x59   : > { %1989 = vmatprep.subr.bf16.mxu1 %v1988_v61  ;;  %2085 = vmatprep.subr.bf16.mxu0 %v2084_v14 }
  0x5a   : > { %1752 = vmatprep.mubr.f32.mxu1 %v2442_v28  ;;  %1884 = vmatprep.mubr.f32.mxu0 %v2442_v28  ;;  %v2000_v53 = vpack.c.bf16 %v533_v45, %v526_v12 }
  0x5c   : > { %1991 = vmatpush3.bf16.msra.mxu1 %v1988_v61  ;;  %2087 = vmatpush3.bf16.msra.mxu0 %v2084_v14 }
  0x5d   : > { %1993 = vmatprep.subr.bf16.mxu1 %v1992_v3  ;;  %2089 = vmatprep.subr.bf16.mxu0 %v2088_v26 }
  0x60   : > { %1995 = vmatpush3.bf16.msra.mxu1 %v1992_v3  ;;  %2091 = vmatpush3.bf16.msra.mxu0 %v2088_v26 }
  0x61   : > { %1997 = vmatprep.subr.bf16.mxu1 %v1996_v7  ;;  %2093 = vmatprep.subr.bf16.mxu0 %v2092_v37 }
  0x64   : > { %1999 = vmatpush3.bf16.msra.mxu1 %v1996_v7  ;;  %2095 = vmatpush3.bf16.msra.mxu0 %v2092_v37 }
  0x65   : > { %2001 = vmatprep.subr.bf16.mxu1 %v2000_v53  ;;  %2097 = vmatprep.subr.bf16.mxu0 %v2096_v19 }
  0x68   : > { %2003 = vmatpush3.bf16.msra.mxu1 %v2000_v53  ;;  %2099 = vmatpush3.bf16.msra.mxu0 %v2096_v19 }
  0x69   : > { %2005 = vmatprep.subr.bf16.mxu1 %v2004_v39  ;;  %2101 = vmatprep.subr.bf16.mxu0 %v2403_v18 }
  0x6b   : > { %1753 = vmatmul.mubr.f32.vlgmr.msra.gmra.mrb[0].mxu1 %v2512_v48  ;;  %1885 = vmatmul.mubr.f32.vlgmr.msra.gmra.mrb[0].mxu0 %v2512_v48 }
  0x6c   : > { %2007 = vmatpush3.bf16.msra.mxu1 %v2004_v39  ;;  %2103 = vmatpush3.bf16.msra.mxu0 %v2403_v18  ;;  %v2016_v18 = vpack.c.bf16 %v2627_v55, %v2612_v17  ;;  %v3003_v17 = vld [vmem:[#allocation22_spill] sm:$0xff] }
  0x6d   : > { %2009 = vmatprep.subr.bf16.mxu1 %v2008_v41  ;;  %2105 = vmatprep.subr.bf16.mxu0 %v2407_v21 }
  0x6e   : > { %1755 = vmatprep.mubr.f32.mxu1 %v2558_v63  ;;  %1887 = vmatprep.mubr.f32.mxu0 %v2558_v63 }
  0x6f   : > { %1756 = vmatmul.mubr.f32.gmra.mrb[2].mxu1 %v2588_v10  ;;  %1888 = vmatmul.mubr.f32.gmra.mrb[2].mxu0 %v2588_v10 }
  0x70   : > { %2011 = vmatpush3.bf16.msra.mxu1 %v2008_v41  ;;  %2107 = vmatpush3.bf16.msra.mxu0 %v2407_v21  ;;  %v2020_v21 = vpack.c.bf16 %v2670_v16, %v2665_v8  ;;  %v3001_v8 = vld [vmem:[#allocation19_spill] sm:$0xff] }
  0x71   : > { %2013 = vmatprep.subr.bf16.mxu1 %v2012_v42  ;;  %2109 = vmatprep.subr.bf16.mxu0 %v2437_v25 }
  0x72   : > { %1758 = vmatprep.mubr.f32.mxu1 %v2601_v13  ;;  %1890 = vmatprep.mubr.f32.mxu0 %v2601_v13 }
  0x73   : > { %1759 = vmatmul.mubr.f32.gmra.mrb[4].mxu1 %v2641_v4  ;;  %1891 = vmatmul.mubr.f32.gmra.mrb[4].mxu0 %v2641_v4 }
  0x74   : > { %2015 = vmatpush3.bf16.msra.mxu1 %v2012_v42  ;;  %2111 = vmatpush3.bf16.msra.mxu0 %v2437_v25  ;;  %v2024_v25 = vpack.c.bf16 %v2704_v24, %v2683_v2  ;;  %v2032_v24 = vpack.c.bf16 %v2752_v23, %v2747_v49  ;;  %v3000_v2 = vld [vmem:[#allocation17_spill] sm:$0xff] }
  0x75   : > { %2017 = vmatprep.subr.bf16.mxu1 %v2016_v18  ;;  %2113 = vmatprep.subr.bf16.mxu0 %v2466_v32 }
  0x76   : > { %1761 = vmatprep.mubr.f32.mxu1 %v2651_v62  ;;  %1893 = vmatprep.mubr.f32.mxu0 %v2651_v62 }
  0x77   : > { %1762 = vmatmul.mubr.f32.gmra.mrb[6].mxu1 %v2694_v0  ;;  %1894 = vmatmul.mubr.f32.gmra.mrb[6].mxu0 %v2694_v0 }
  0x78   : > { %2019 = vmatpush3.bf16.msra.mxu1 %v2016_v18  ;;  %2115 = vmatpush3.bf16.msra.mxu0 %v2466_v32  ;;  %v2998_v32 = vld [vmem:[#allocation15_spill] sm:$0xff] }
  0x79   : > { %2021 = vmatprep.subr.bf16.mxu1 %v2020_v21  ;;  %2117 = vmatprep.subr.bf16.mxu0 %v2995_v43 }
  0x7a   : > { %1796 = vmatprep.mubr.f32.mxu1 %v2996_v52  ;;  %1928 = vmatprep.mubr.f32.mxu0 %v2442_v28  ;;  %v2999_v28 = vld [vmem:[#allocation16_spill] sm:$0xff] }
  0x7c   : > { %2023 = vmatpush3.bf16.msra.mxu1 %v2020_v21  ;;  %2119 = vmatpush3.bf16.msra.mxu0 %v2995_v43 }
  0x7d   : > { %2025 = vmatprep.subr.bf16.mxu1 %v2024_v25  ;;  %2121 = vmatprep.subr.bf16.mxu0 %v2997_v57 }
  0x80   : > { %2027 = vmatpush3.bf16.msra.mxu1 %v2024_v25  ;;  %2123 = vmatpush3.bf16.msra.mxu0 %v2997_v57 }
  0x81   : > { %2029 = vmatprep.subr.bf16.mxu1 %v2028_v60  ;;  %2125 = vmatprep.subr.bf16.mxu0 %v2998_v32 }
  0x84   : > { %2031 = vmatpush3.bf16.msra.mxu1 %v2028_v60  ;;  %2127 = vmatpush3.bf16.msra.mxu0 %v2998_v32 }
  0x85   : > { %2033 = vmatprep.subr.bf16.mxu1 %v2032_v24  ;;  %2129 = vmatprep.subr.bf16.mxu0 %v2999_v28 }
  0x88   : > { %2035 = vmatpush3.bf16.msra.mxu1 %v2032_v24  ;;  %2131 = vmatpush3.bf16.msra.mxu0 %v2999_v28 }
  0x8b   : > { %1797 = vmatmul.mubr.f32.vlgmr.msra.gmra.mrb[0].mxu1 %v2548_v59  ;;  %1929 = vmatmul.mubr.f32.vlgmr.msra.gmra.mrb[0].mxu0 %v2512_v48  ;;  %v2296_v48 = vmov 0  }
  0x8c   : > { %1799 = vmatprep.mubr.f32.mxu1 %v3000_v2  ;;  %1931 = vmatprep.mubr.f32.mxu0 %v2558_v63 }
  0x8d   : > { %2213 = vset.pattern.permute.xlu1 %v2296_v48  ;;  %2212 = vset.pattern.permute.xlu0 %v2296_v48 }
  0x8f   : > { %1800 = vmatmul.mubr.f32.gmra.mrb[2].mxu1 %v3001_v8  ;;  %1932 = vmatmul.mubr.f32.gmra.mrb[2].mxu0 %v2588_v10 }
  0x90   : > { %1802 = vmatprep.mubr.f32.mxu1 %v3002_v9  ;;  %1934 = vmatprep.mubr.f32.mxu0 %v2601_v13 }
  0x93   : > { %1803 = vmatmul.mubr.f32.gmra.mrb[4].mxu1 %v3003_v17  ;;  %1935 = vmatmul.mubr.f32.gmra.mrb[4].mxu0 %v2641_v4 }
  0x94   : > { %1805 = vmatprep.mubr.f32.mxu1 %v2688_v34  ;;  %1937 = vmatprep.mubr.f32.mxu0 %v2651_v62 }
  0x97   : > { %1806 = vmatmul.mubr.f32.gmra.mrb[6].mxu1 %v2711_v11  ;;  %1938 = vmatmul.mubr.f32.gmra.mrb[6].mxu0 %v2694_v0 }
 0x15e   : > { %v1798_v59 = vpop.f32.mrb[0].mxu1  ;;  %v1930_v63 = vpop.f32.mrb[0].mxu0 }
 0x15f   : > { %v2132_v10 = vadd.f32 %v1930_v63, %v1798_v59  ;;  %v716_v55 = vpop.f32.mrb[1].mxu1  ;;  %v1158_v13 = vpop.f32.mrb[1].mxu0 }
 0x160   : > { %v2133_v16 = vadd.f32 %v1158_v13, %v716_v55 }
 0x161   : > { %v1206_v27 = vsel %vm1204_vm0, %v2132_v10, -inf }
 0x162   : > { %v1801_v47 = vpop.f32.mrb[2].mxu1  ;;  %v1933_v15 = vpop.f32.mrb[2].mxu0  ;;  %v1205_v49 = vsel %vm1204_vm0, %v2133_v16, -inf }
 0x163   : > { %v2134_v4 = vadd.f32 %v1933_v15, %v1801_v47  ;;  %v730_v46 = vpop.f32.mrb[3].mxu1  ;;  %v1170_v34 = vpop.f32.mrb[3].mxu0 }
 0x164   : > { %v2135_v22 = vadd.f32 %v1170_v34, %v730_v46 }
 0x165   : > { %v1208_v29 = vsel %vm1204_vm0, %v2134_v4, -inf }
 0x166   : > { %v1804_v62 = vpop.f32.mrb[4].mxu1  ;;  %v1936_v11 = vpop.f32.mrb[4].mxu0  ;;  %v1207_v3 = vsel %vm1204_vm0, %v2135_v22, -inf }
 0x167   : > { %v2136_v58 = vadd.f32 %v1936_v11, %v1804_v62  ;;  %v744_v0 = vpop.f32.mrb[5].mxu1  ;;  %v1182_v44 = vpop.f32.mrb[5].mxu0 }
 0x168   : > { %v2137_v54 = vadd.f32 %v1182_v44, %v744_v0 }
 0x169   : > { %v1211_v5 = vsel %vm1204_vm0, %v2136_v58, -inf }
 0x16a   : > { %v1212_v38 = vmax.f32 %v1206_v27, %v1211_v5  ;;  %v1209_v23 = vsel %vm1204_vm0, %v2137_v54, -inf  ;;  %v1807_v31 = vpop.f32.mrb[6].mxu1  ;;  %v1939_v6 = vpop.f32.mrb[6].mxu0 }
 0x16b   : > { %v1210_v61 = vmax.f32 %v1205_v49, %v1209_v23  ;;  %v2138_v14 = vadd.f32 %v1939_v6, %v1807_v31  ;;  %v758_v36 = vpop.f32.mrb[7].mxu1  ;;  %v1194_v56 = vpop.f32.mrb[7].mxu0 }
 0x16c   : > { %v2139_v50 = vadd.f32 %v1194_v56, %v758_v36  ;;  %v3004_v56 = vld [vmem:[#allocation9_spill] sm:$0xff] }
 0x16d   : > { %v1217_v51 = vmax.f32 %v1210_v61, %v1212_v38  ;;  %v1215_v30 = vsel %vm1204_vm0, %v2138_v14, -inf }
 0x16e   : > { %v1216_v20 = vmax.f32 %v1208_v29, %v1215_v30  ;;  %v1213_v26 = vsel %vm1204_vm0, %v2139_v50, -inf }
 0x16f   : > { %v1214_v33 = vmax.f32 %v1207_v3, %v1213_v26 }
 0x171   : > { %v1218_v40 = vmax.f32 %v1214_v33, %v1216_v20  ;;  %v3006_v20 = vld [vmem:[#allocation11_spill] sm:$0xff] }
 0x173   : > { %v1219_v1 = vmax.f32 %v1217_v51, %v1218_v40  ;;  %v3005_v51 = vld [vmem:[#allocation7_spill] sm:$0xff] }
 0x175   : > { %v1226_v35 = vsub.f32 %v2139_v50, %v1219_v1  ;;  %v1222_v7 = vsub.f32 %v2135_v22, %v1219_v1  ;;  %v1220_v37 = vsub.f32 %v2133_v16, %v1219_v1  ;;  %v1223_v12 = vsub.f32 %v2134_v4, %v1219_v1 }
 0x176   : > { %v1221_v45 = vsub.f32 %v2132_v10, %v1219_v1  ;;  %v1225_v53 = vsub.f32 %v2136_v58, %v1219_v1  ;;  %v1224_v19 = vsub.f32 %v2137_v54, %v1219_v1  ;;  %v1227_v39 = vsub.f32 %v2138_v14, %v1219_v1  ;;  %v3007_v1 = vld [vmem:[#allocation13_spill] sm:$0xff] }
 0x177   : > { %v1232_v41 = vmul.f32 1.442695, %v1222_v7  ;;  %v1228_v42 = vmul.f32 1.442695, %v1220_v37  ;;  %v1234_v21 = vmul.f32 1.442695, %v1223_v12 }
 0x178   : > { %v1230_v18 = vmul.f32 1.442695, %v1221_v45  ;;  %v1236_v43 = vmul.f32 1.442695, %v1224_v19  ;;  %v1238_v25 = vmul.f32 1.442695, %v1225_v53 }
 0x179   : > { %2214 = vpow2.f32 %v1232_v41  ;;  %v1240_v52 = vmul.f32 1.442695, %v1226_v35  ;;  %v1242_v57 = vmul.f32 1.442695, %v1227_v39  ;;  %v3008_v12 = vld [vmem:[#allocation14_spill] sm:$0xff] }
 0x17a   : > { %2216 = vpow2.f32 %v1228_v42  ;;  %v3009_v39 = vld [vmem:[#allocation18_spill] sm:$0xff] }
 0x17b   : > { %2218 = vpow2.f32 %v1230_v18 }
 0x17c   : > { %2220 = vpow2.f32 %v1234_v21  ;;  %v3010_v21 = vld [vmem:[#allocation20_spill] sm:$0xff] }
 0x17d   : > { %2222 = vpow2.f32 %v1236_v43 }
 0x17e   : > { %2224 = vpow2.f32 %v1238_v25 }
 0x17f   : > { %2226 = vpow2.f32 %v1240_v52 }
 0x180   : > { %2228 = vpow2.f32 %v1242_v57  ;;  %v3011_v57 = vld [vmem:[#allocation23_spill] sm:$0xff] }
 0x183   : > { %v2215_v60 = vpop.eup %2214 }
 0x184   : > { %v2217_v32 = vpop.eup %2216  ;;  %1275 = vperm.xlu1 %2213, %v2215_v60   ;;  %v1247_v17 = vsel %vm1204_vm0, %v2215_v60, 0.0 }
 0x185   : > { %1265 = vperm.xlu0 %2212, %v2217_v32   ;;  %v1244_v24 = vsel %vm1204_vm0, %v2217_v32, 0.0  ;;  %v2219_v28 = vpop.eup %2218 }
 0x186   : > { %v2221_v2 = vpop.eup %2220  ;;  %v1245_v8 = vsel %vm1204_vm0, %v2219_v28, 0.0 }
 0x187   : > { %v1246_v9 = vadd.f32 %v1245_v8, %v1244_v24  ;;  %v2223_v48 = vpop.eup %2222  ;;  %v1249_v10 = vsel %vm1204_vm0, %v2221_v2, 0.0 }
 0x188   : > { %1280 = vperm.xlu1 %2213, %v2221_v2   ;;  %v2225_v63 = vpop.eup %2224  ;;  %v1251_v13 = vsel %vm1204_vm0, %v2223_v48, 0.0 }
 0x189   : > { %1270 = vperm.xlu0 %2212, %v2219_v28   ;;  %v1248_v59 = vadd.f32 %v1247_v17, %v1246_v9  ;;  %v2227_v16 = vpop.eup %2226  ;;  %v1253_v4 = vsel %vm1204_vm0, %v2225_v63, 0.0 }
 0x18a   : > { %v2229_v15 = vpop.eup %2228  ;;  %v1255_v34 = vsel %vm1204_vm0, %v2227_v16, 0.0 }
 0x18b   : > { %v1250_v55 = vadd.f32 %v1249_v10, %v1248_v59  ;;  %v1257_v62 = vsel %vm1204_vm0, %v2229_v15, 0.0 }
 0x18c   : > { %1290 = vperm.xlu1 %2213, %v2225_v63  }
 0x18d   : > { %1285 = vperm.xlu0 %2212, %v2223_v48   ;;  %v1252_v47 = vadd.f32 %v1251_v13, %v1250_v55 }
 0x18f   : > { %v1254_v46 = vadd.f32 %v1253_v4, %v1252_v47 }
 0x190   : > { %1300 = vperm.xlu1 %2213, %v2229_v15  }
 0x191   : > { %1295 = vperm.xlu0 %2212, %v2227_v16   ;;  %v1256_v22 = vadd.f32 %v1255_v34, %v1254_v46 }
 0x193   : > { %v1258_v11 = vadd.f32 %v1257_v62, %v1256_v22 }
 0x195   : > { %2230 = vrcp.f32 %v1258_v11 }
 0x19f   : > { %v2231_v58 = vpop.eup %2230 }
 0x1a0   : > { %v1260_v0 = vmul.f32 %v2231_v58, %v1258_v11 }
 0x1a2   : > { %v1261_v44 = vsub.f32 2.0, %v1260_v0 }
 0x1a4   : > { %v1262_v54 = vmul.f32 %v2231_v58, %v1261_v44 }
 0x1a6   : > { %v1325_v27 = vmul.f32 %v2217_v32, %v1262_v54  ;;  %v1326_v5 = vmul.f32 %v2219_v28, %v1262_v54  ;;  %v1327_v49 = vmul.f32 %v2215_v60, %v1262_v54  ;;  %v1328_v38 = vmul.f32 %v2221_v2, %v1262_v54  ;;  %1320 = vperm.xlu0 %2212, %v1262_v54  }
 0x1a7   : > { %v1329_v23 = vmul.f32 %v2223_v48, %v1262_v54  ;;  %v1330_v31 = vmul.f32 %v2225_v63, %v1262_v54  ;;  %v1331_v6 = vmul.f32 %v2227_v16, %v1262_v54  ;;  %v1332_v61 = vmul.f32 %v2229_v15, %v1262_v54 }
 0x1a8   : > { %1333 = vst.msk [vmem:[%s2844_s4] sm:$0xff] %vm1204_vm0, %v1325_v27  ;;  %1334 = vst.msk [vmem:[%s2844_s4 + $0x8] sm:$0xff] %vm1204_vm0, %v1326_v5 }
 0x1a9   : > { %1335 = vst.msk [vmem:[%s2844_s4 + $0x10] sm:$0xff] %vm1204_vm0, %v1327_v49  ;;  %1336 = vst.msk [vmem:[%s2844_s4 + $0x18] sm:$0xff] %vm1204_vm0, %v1328_v38 }
 0x1aa   : > { %1337 = vst.msk [vmem:[%s2844_s4 + $0x20] sm:$0xff] %vm1204_vm0, %v1329_v23  ;;  %1338 = vst.msk [vmem:[%s2844_s4 + $0x28] sm:$0xff] %vm1204_vm0, %v1330_v31 }
 0x1ab   : > { %1339 = vst.msk [vmem:[%s2844_s4 + $0x30] sm:$0xff] %vm1204_vm0, %v1331_v6  ;;  %1340 = vst.msk [vmem:[%s2844_s4 + $0x38] sm:$0xff] %vm1204_vm0, %v1332_v61 }
 0x203   : > { %v1276_v29 = vpop.permute.xlu1 %1275 }
 0x204   : > { %v1266_v14 = vpop.permute.xlu0 %1265  ;;  %v1305_v26 = vmul.f32 %v1276_v29, %v3006_v20 }
 0x205   : > { %v1303_v30 = vmul.f32 %v1266_v14, %v3005_v51 }
 0x207   : > { %v1281_v33 = vpop.permute.xlu1 %1280 }
 0x208   : > { %v1271_v36 = vpop.permute.xlu0 %1270  ;;  %v1306_v35 = vmul.f32 %v1281_v33, %v3007_v1 }
 0x209   : > { %v1304_v50 = vmul.f32 %v1271_v36, %v3004_v56 }
 0x20b   : > { %v1311_v3 = vadd.f32 %v1304_v50, %v1303_v30  ;;  %v1291_v53 = vpop.permute.xlu1 %1290 }
 0x20c   : > { %v1286_v7 = vpop.permute.xlu0 %1285  ;;  %v1308_v41 = vmul.f32 %v1291_v53, %v3009_v39 }
 0x20d   : > { %v1312_v40 = vadd.f32 %v1311_v3, %v1305_v26  ;;  %v1307_v45 = vmul.f32 %v1286_v7, %v3008_v12 }
 0x20f   : > { %v1313_v37 = vadd.f32 %v1312_v40, %v1306_v35  ;;  %v1301_v25 = vpop.permute.xlu1 %1300 }
 0x210   : > { %v1296_v42 = vpop.permute.xlu0 %1295  ;;  %v1310_v60 = vmul.f32 %v1301_v25, %v3011_v57 }
 0x211   : > { %v1314_v19 = vadd.f32 %v1313_v37, %v1307_v45  ;;  %v1309_v43 = vmul.f32 %v1296_v42, %v3010_v21 }
 0x213   : > { %v1315_v18 = vadd.f32 %v1314_v19, %v1308_v41 }
 0x215   : > { %v1316_v52 = vadd.f32 %v1315_v18, %v1309_v43 }
 0x217   : > { %v1317_v32 = vadd.f32 %v1316_v52, %v1310_v60 }
 0x225   : > { %v1321_v24 = vpop.permute.xlu0 %1320 }
 0x226   : > { %v1323_v28 = vmul.f32 %v1321_v24, %v1317_v32 }
 0x228   : > { %1324 = vst [vmem:[%s231_s7] sm:$0xff] %v1323_v28 }
 0x229   : > { %2245 = shalt.err (!%p2242_p5)
}
 0x22a   : > { %s2246_s10 = scalar_lea.hbm %s2875_s17, 128  ;;  %s2250_s29 = scalar_lea.hbm %s2935_s2, 256 }
 0x22b   : > { %p2247_p7 = scmp.ne.s32.totalorder %s2875_s17, %s2246_s10  ;;  %p2251_p12 = scmp.lt.u32.totalorder %s2875_s17, %s2935_s2 }
 0x22c   : > { %p2252_p13 = scmp.lt.u32.totalorder %s2250_s29, %s2246_s10  ;;  %p2254_p1 = scmp.lt.u32.totalorder %s2246_s10, %s2875_s17 }
 0x22d   : > { %p2248_p10 = pnand %p2247_p7, %p2357_p6 }
 0x22e   : > { %p2253_p0 = por %p2252_p13, %p2251_p12 }
 0x22f   : > { %p2249_p11 = pneg %p2248_p10 }
 0x230   : > { %p2255_p2 = por %p2254_p1, %p2253_p0 }
 0x232   : > { %p2256_p3 = pnand %p2255_p2, %p2249_p11 }
 0x234   : > { %2259 = shalt.err (!%p2256_p3)
}
 0x235   : > { %2172 = dma.vmem_to_hbm [thread:$0]  (%p2357_p6), %s2877_s8, 128, %s2875_s17, %s1342_s19   ;;  %v1409_v2 = vld [vmem:[%s2844_s4] sm:$0xff] (%p2357_p6)  ;;  %v1411_v8 = vld [vmem:[%s2844_s4 + $0x8] sm:$0xff] (%p2357_p6)  ;;  %v1413_v9 = vld [vmem:[%s2844_s4 + $0x10] sm:$0xff] (%p2357_p6) }
 0x236   : > { %1365 = sbr.rel (!%p2357_p6) target bundleno = 573 (0x23d), region = 74  ;;  %s1529_s6 = sshll.u32 (%p2357_p6), %s2339_s16, 3  ;;  %v1415_v17 = vld [vmem:[%s2844_s4 + $0x18] sm:$0xff] (%p2357_p6)  ;;  %v1417_v48 = vld [vmem:[%s2844_s4 + $0x20] sm:$0xff] (%p2357_p6)  ;;  %v1419_v59 = vld [vmem:[%s2844_s4 + $0x28] sm:$0xff] (%p2357_p6) }
 0x237   : > { %s1367_s8 = scalar_lea.vmem (%p2357_p6), %s2936_s3, %s1529_s6  ;;  %v1421_v63 = vld [vmem:[%s2844_s4 + $0x30] sm:$0xff] (%p2357_p6)  ;;  %v1423_v10 = vld [vmem:[%s2844_s4 + $0x38] sm:$0xff] (%p2357_p6) }
 0x238   : > { %1410 = vst [vmem:[%s1367_s8] sm:$0xff] (%p2357_p6), %v1409_v2  ;;  %1412 = vst [vmem:[%s1367_s8 + $0x10] sm:$0xff] (%p2357_p6), %v1411_v8 }
 0x239   : > { %1414 = vst [vmem:[%s1367_s8 + $0x20] sm:$0xff] (%p2357_p6), %v1413_v9  ;;  %1416 = vst [vmem:[%s1367_s8 + $0x30] sm:$0xff] (%p2357_p6), %v1415_v17 }
 0x23a   : > { %1418 = vst [vmem:[%s1367_s8 + $0x40] sm:$0xff] (%p2357_p6), %v1417_v48  ;;  %1420 = vst [vmem:[%s1367_s8 + $0x50] sm:$0xff] (%p2357_p6), %v1419_v59 }
 0x23b   : > { %1422 = vst [vmem:[%s1367_s8 + $0x60] sm:$0xff] (%p2357_p6), %v1421_v63  ;;  %1424 = vst [vmem:[%s1367_s8 + $0x70] sm:$0xff] (%p2357_p6), %v1423_v10 }
 0x23d PF: > { %s1436_s16 = sand.u32 1, %s2282_s12   ;;  %p2175_p6 = pnand %p1519_p9, %p2361_p8 }
 0x23e   : > { %s1437_s22 = scalar_lea.sflag [#allocation4], %s1436_s16 }
 0x23f   : > { %2277 = dma.done.wait (!%p2175_p6), %s1437_s22, 128  }
 0x240   : > { %2279 = vsyncadd (!%p2175_p6), %s1437_s22, 4294967168  ;;  %p14_p4 = scmp.ge.s32.totalorder %s2343_s18, 4   ;;  %s3012_s12 = smov %s2286_s13 }
 0x241   : > { %s3013_s13 = smov %s2290_s14  ;;  %s3014_s14 = smov %s2355_s21 }
 0x242   : > { %s3015_s15 = smov %s2343_s18  ;;  %16 = sbr.rel (!%p14_p4) target bundleno = 3 (0x3), region = 156 }
 0x249   :  { %1449 = vsyncpa [#allocation4], 1 }
 0x24a   :  { %1451 = vsyncpa [#allocation4 + $0x1], 1 }

</bundles_post_ra>
